<compile_context>
chip_gen: v6e
topology: v6e:2x2x1
jax: 0.10.0
libtpu: 0.0.40
codegen_flags: <defaults>
</compile_context>

<pallas_src>
import functools
import math

import jax
import jax.numpy as jnp
from jax.experimental import pallas as pl
from jax.experimental.pallas import tpu as pltpu


def _round_up(x, m):
    return ((x + m - 1) // m) * m


def _pick_t_blk(seq_len, b_blk, h_pad, cap=32, vmem_budget=32 * 1024 * 1024):
    """Largest time block <= cap fitting a conservative VMEM byte budget,
    preferring a divisor of seq_len so no trailing time padding is needed."""
    per_step = 2 * 2 * b_blk * h_pad * 4                 # drive + act, double-buffered
    fixed = 2 * h_pad * h_pad * 4 + b_blk * h_pad * 4    # eff_w (2 bufs) + state scratch
    avail = max(vmem_budget - fixed, per_step)
    cap = int(max(1, min(cap, avail // per_step, seq_len)))
    for cand in range(cap, max(cap // 2, 1) - 1, -1):
        if seq_len % cand == 0:
            return cand
    return cap  # no nice divisor -> wrapper zero-pads seq_len up to a multiple of cap


def _eirnn_kernel(drive_ref, eff_w_ref, act_ref, state_sc, *,
                  one_minus_alpha, t_blk, unroll):
    # hidden state zero-initialized at the first time block of each batch block.
    @pl.when(pl.program_id(1) == 0)
    def _():
        state_sc[...] = jnp.zeros_like(state_sc)

    # Time-invariant recurrent weight (alpha already folded in), loaded once
    # per grid step and hoisted out of the per-timestep loop.
    eff_w = eff_w_ref[...]                      # (H_pad, H_pad) = (alpha*|W|*mask)^T

    def step(t, state):
        # output_prev = relu(state_prev); relu(0)=0 covers the t==0 case, so
        # only the post-noise state needs to be carried.
        rate_prev = jnp.maximum(state, 0.0)
        state = (state * one_minus_alpha
                 + drive_ref[t]                 # alpha*(x@W_in^T + b_in + b_h) + noise
                 + jnp.dot(rate_prev, eff_w,
                           preferred_element_type=jnp.float32))
        act_ref[t] = jnp.maximum(state, 0.0)    # rnn_activity[t]
        return state

    state_sc[...] = jax.lax.fori_loop(0, t_blk, step, state_sc[...],
                                      unroll=unroll)


def ei_rnn_net_forward(x, noise, params, *, alpha, e_size,
                       t_blk=None, vmem_budget=32 * 1024 * 1024):
    """Pallas forward for Net: returns (out, rnn_activity)."""
    seq_len, batch, _ = x.shape
    hidden_size = params["w_h"].shape[0]

    # ---- Lane/sublane padding --------------------------------------------
    h_pad = _round_up(hidden_size, 128)              # lane-dense last dim
    b_pad8 = _round_up(batch, 8)                     # full sublane rows
    # >=2 batch blocks when batch is large enough -> both TCs on v7x.
    b_blk = _round_up(b_pad8 // 2, 8) if b_pad8 >= 16 else b_pad8
    batch_pad = _round_up(b_pad8, b_blk)

    if t_blk is None:
        t_blk = _pick_t_blk(seq_len, b_blk, h_pad, vmem_budget=vmem_budget)
    seq_pad = _round_up(seq_len, t_blk)
    unroll = int(min(t_blk, 8))                      # bounded partial unroll

    # ---- Time-invariant hoists (done once, in XLA) ------------------------
    # EIRecLinear effective weight with alpha folded in, pre-transposed and
    # zero-padded; padded rows/cols keep padded lanes exactly zero.
    eff_w_alpha_t = alpha * (jnp.abs(params["w_h"]) * params["mask"]).T
    eff_w_p = jnp.zeros((h_pad, h_pad), jnp.float32).at[
        :hidden_size, :hidden_size].set(eff_w_alpha_t)

    # Input projection is recurrence-independent: one dense matmul over the
    # whole sequence, off the serial time chain.  Noise and the combined
    # alpha*(b_in+b_h) bias are folded in so the kernel streams a single
    # (S, B, H) drive tensor (halves the per-step HBM read traffic).
    drive = (alpha * (jnp.einsum('sbi,hi->sbh', x, params["w_in"])
                      + (params["b_in"] + params["b_h"]))
             + noise)
    drive_p = jnp.zeros((seq_pad, batch_pad, h_pad), jnp.float32).at[
        :seq_len, :batch, :hidden_size].set(drive)

    kernel = functools.partial(_eirnn_kernel, one_minus_alpha=1.0 - alpha,
                               t_blk=t_blk, unroll=unroll)

    act_p = pl.pallas_call(
        kernel,
        out_shape=jax.ShapeDtypeStruct((seq_pad, batch_pad, h_pad),
                                       jnp.float32),
        grid_spec=pltpu.PrefetchScalarGridSpec(
            num_scalar_prefetch=0,
            grid=(batch_pad // b_blk, seq_pad // t_blk),
            in_specs=[
                pl.BlockSpec((t_blk, b_blk, h_pad), lambda b, t: (t, b, 0)),
                pl.BlockSpec((h_pad, h_pad), lambda b, t: (0, 0)),
            ],
            out_specs=pl.BlockSpec((t_blk, b_blk, h_pad),
                                   lambda b, t: (t, b, 0)),
            scratch_shapes=[
                pltpu.VMEM((b_blk, h_pad), jnp.float32),  # state carry
            ],
        ),
        compiler_params=pltpu.CompilerParams(
            # batch blocks are independent (megacore on v7x); time is a
            # sequential recurrence -> must stay "arbitrary".
            dimension_semantics=("parallel", "arbitrary"),
            vmem_limit_bytes=48 * 1024 * 1024,
        ),
    )(drive_p, eff_w_p)

    rnn_activity = act_p[:seq_len, :batch, :hidden_size]
    # Excitatory-only readout never feeds back -> bulk XLA matmul.
    out = (jnp.einsum('sbe,oe->sbo', rnn_activity[..., :e_size],
                      params["w_fc"]) + params["b_fc"])
    return out, rnn_activity


def ei_rnn_net_reference(x, noise, params, *, alpha, e_size):
    """Pure-JAX reference mirroring the PyTorch Net forward."""
    eff_w = jnp.abs(params["w_h"]) * params["mask"]

    def step(carry, inp):
        state, output = carry
        x_t, n_t = inp
        total_input = (x_t @ params["w_in"].T + params["b_in"]
                       + output @ eff_w.T + params["b_h"])
        state = state * (1.0 - alpha) + total_input * alpha + n_t
        output = jnp.maximum(state, 0.0)
        return (state, output), output

    batch = x.shape[1]
    hidden = params["w_h"].shape[0]
    init = (jnp.zeros((batch, hidden), jnp.float32),
            jnp.zeros((batch, hidden), jnp.float32))
    _, act = jax.lax.scan(step, init, (x, noise))
    out = act[:, :, :e_size] @ params["w_fc"].T + params["b_fc"]
    return out, act


def init_params(key, input_size, hidden_size, output_size, e_prop=0.8):
    """Deterministic synthetic parameter init mirroring the module's shapes."""
    e_size = int(e_prop * hidden_size)
    i_size = hidden_size - e_size
    k = jax.random.split(key, 6)

    # input2h: nn.Linear(input_size, hidden_size) -> W (H, I), b (H,)
    bnd_in = 1.0 / math.sqrt(input_size)
    w_in = jax.random.uniform(k[0], (hidden_size, input_size),
                              minval=-bnd_in, maxval=bnd_in, dtype=jnp.float32)
    b_in = jax.random.uniform(k[1], (hidden_size,),
                              minval=-bnd_in, maxval=bnd_in, dtype=jnp.float32)

    # h2h: EIRecLinear(hidden_size) -> W (H, H), b (H,), fixed mask (H, H)
    bnd_h = 1.0 / math.sqrt(hidden_size)
    w_h = jax.random.uniform(k[2], (hidden_size, hidden_size),
                             minval=-bnd_h, maxval=bnd_h, dtype=jnp.float32)
    # reset_parameters: scale excitatory columns by i_size / e_size
    w_h = w_h.at[:, :e_size].multiply(i_size / e_size)
    b_h = jax.random.uniform(k[3], (hidden_size,),
                             minval=-bnd_h, maxval=bnd_h, dtype=jnp.float32)
    mask_row = jnp.concatenate(
        [jnp.ones((e_size,), jnp.float32), -jnp.ones((i_size,), jnp.float32)])
    mask = jnp.tile(mask_row, (hidden_size, 1))
    mask = mask * (1.0 - jnp.eye(hidden_size, dtype=jnp.float32))  # zero diag

    # fc: nn.Linear(e_size, output_size) -> W (O, E), b (O,)
    bnd_fc = 1.0 / math.sqrt(e_size)
    w_fc = jax.random.uniform(k[4], (output_size, e_size),
                              minval=-bnd_fc, maxval=bnd_fc, dtype=jnp.float32)
    b_fc = jax.random.uniform(k[5], (output_size,),
                              minval=-bnd_fc, maxval=bnd_fc, dtype=jnp.float32)

    return dict(w_in=w_in, b_in=b_in, w_h=w_h, b_h=b_h, mask=mask,
                w_fc=w_fc, b_fc=b_fc), e_size


if __name__ == "__main__":
    # Small shapes consistent with the module's forward
    seq_len = 8
    batch = 2
    input_size = 4
    hidden_size = 32
    output_size = 3

    dt, tau, sigma_rec = 20.0, 100.0, 0.15
    alpha = dt / tau
    sigma_rec_eff = math.sqrt(2.0 * alpha) * sigma_rec

    key = jax.random.PRNGKey(0)
    k_x, k_noise, k_par = jax.random.split(key, 3)

    params, e_size = init_params(k_par, input_size, hidden_size, output_size)

    x = jax.random.normal(k_x, (seq_len, batch, input_size), dtype=jnp.float32)
    # state += sigma_rec_eff * randn_like(state): pre-sampled (deterministic)
    noise = sigma_rec_eff * jax.random.normal(
        k_noise, (seq_len, batch, hidden_size), dtype=jnp.float32)

    fwd = jax.jit(functools.partial(ei_rnn_net_forward,
                                    alpha=alpha, e_size=e_size))
    out, rnn_activity = fwd(x, noise, params)
    jax.block_until_ready((out, rnn_activity))

    assert out.shape == (seq_len, batch, output_size)
    assert rnn_activity.shape == (seq_len, batch, hidden_size)

    # Structural correctness check against a pure-JAX reference (loose tol to
    # absorb MXU precision differences between Pallas and XLA matmuls).
    out_ref, act_ref = ei_rnn_net_reference(
        x, noise, params, alpha=alpha, e_size=e_size)
    max_err = max(float(jnp.max(jnp.abs(out - out_ref))),
                  float(jnp.max(jnp.abs(rnn_activity - act_ref))))
    assert max_err < 5e-2, f"max abs error too large: {max_err}"

    print("KERNEL_OK")
</pallas_src>

<mosaic_0001>
module attributes {stable_mosaic.version = 11 : i64} {
  func.func @_eirnn_kernel(%arg0: i32, %arg1: i32, %arg2: memref<8x8x128xf32, #tpu.memory_space<vmem>>, %arg3: memref<128x128xf32, #tpu.memory_space<vmem>>, %arg4: memref<8x8x128xf32, #tpu.memory_space<vmem>>, %arg5: memref<8x128xf32, #tpu.memory_space<vmem>>) attributes {dimension_semantics = [#tpu.dimension_semantics<parallel>, #tpu.dimension_semantics<arbitrary>], iteration_bounds = array<i64: 1, 1>, scalar_prefetch = 0 : i64, scratch_operands = 1 : i64, tpu.core_type = #tpu.core_type<tc>, window_params = [{transform_indices = @transform_0, window_bounds = array<i64: 8, 8, 128>}, {pipeline_mode = #tpu.pipeline_mode<synchronous>, transform_indices = @transform_1, window_bounds = array<i64: 128, 128>}, {transform_indices = @transform_2, window_bounds = array<i64: 8, 8, 128>}]} {
    %c0_i32 = arith.constant 0 : i32
    %0 = arith.cmpi eq, %arg1, %c0_i32 : i32
    %1 = arith.extui %0 : i1 to i32
    %c0_i32_0 = arith.constant 0 : i32
    %2 = arith.cmpi ne, %1, %c0_i32_0 : i32
    scf.if %2 {
      %cst_70 = arith.constant 0.000000e+00 : f32
      %134 = vector.broadcast %cst_70 : f32 to vector<8x128xf32>
      %c0_71 = arith.constant 0 : index
      %c0_72 = arith.constant 0 : index
      %135 = vector.load %arg5[%c0_71, %c0_72] : memref<8x128xf32, #tpu.memory_space<vmem>>, vector<8x128xf32>
      tpu.vector_store %arg5[%c0_71, %c0_72], %134 {strides = array<i32>} : memref<8x128xf32, #tpu.memory_space<vmem>>, vector<8x128xf32>,
    } else {
    }
    %c0 = arith.constant 0 : index
    %c0_1 = arith.constant 0 : index
    %3 = vector.load %arg3[%c0, %c0_1] : memref<128x128xf32, #tpu.memory_space<vmem>>, vector<128x128xf32>
    %c0_2 = arith.constant 0 : index
    %c0_3 = arith.constant 0 : index
    %4 = vector.load %arg5[%c0_2, %c0_3] : memref<8x128xf32, #tpu.memory_space<vmem>>, vector<8x128xf32>
    %c0_i32_4 = arith.constant 0 : i32
    %cst = arith.constant 0.000000e+00 : f32
    %5 = vector.broadcast %cst : f32 to vector<8x128xf32>
    %6 = arith.maximumf %4, %5 : vector<8x128xf32>
    %cst_5 = arith.constant 8.000000e-01 : f32
    %7 = vector.broadcast %cst_5 : f32 to vector<8x128xf32>
    %8 = arith.mulf %4, %7 : vector<8x128xf32>
    %9 = arith.index_cast %c0_i32_4 : i32 to index
    %c0_6 = arith.constant 0 : index
    %c0_7 = arith.constant 0 : index
    %10 = vector.load %arg2[%9, %c0_6, %c0_7] : memref<8x8x128xf32, #tpu.memory_space<vmem>>, vector<1x8x128xf32>
    %11 = vector.shape_cast %10 : vector<1x8x128xf32> to vector<8x128xf32>
    %12 = arith.addf %8, %11 : vector<8x128xf32>
    %cst_8 = arith.constant dense<0.000000e+00> : vector<8x128xf32>
    %13 = tpu.matmul %6, %3, %cst_8 {dimension_numbers = #tpu.dot_dimension_numbers<[1], [0], [0], [1], [0, 0, 1, 1], [], []>} : vector<8x128xf32>, vector<128x128xf32>, vector<8x128xf32> -> vector<8x128xf32>
    %14 = arith.addf %12, %13 : vector<8x128xf32>
    %cst_9 = arith.constant 0.000000e+00 : f32
    %15 = vector.broadcast %cst_9 : f32 to vector<8x128xf32>
    %16 = arith.maximumf %14, %15 : vector<8x128xf32>
    %17 = arith.index_cast %c0_i32_4 : i32 to index
    %c0_10 = arith.constant 0 : index
    %c0_11 = arith.constant 0 : index
    %18 = vector.load %arg4[%17, %c0_10, %c0_11] : memref<8x8x128xf32, #tpu.memory_space<vmem>>, vector<1x8x128xf32>
    %19 = vector.shape_cast %18 : vector<1x8x128xf32> to vector<8x128xf32>
    %20 = vector.shape_cast %16 : vector<8x128xf32> to vector<1x8x128xf32>
    tpu.vector_store %arg4[%17, %c0_10, %c0_11], %20 {strides = array<i32>} : memref<8x8x128xf32, #tpu.memory_space<vmem>>, vector<1x8x128xf32>,
    %c1_i32 = arith.constant 1 : i32
    %cst_12 = arith.constant 0.000000e+00 : f32
    %21 = vector.broadcast %cst_12 : f32 to vector<8x128xf32>
    %22 = arith.maximumf %14, %21 : vector<8x128xf32>
    %cst_13 = arith.constant 8.000000e-01 : f32
    %23 = vector.broadcast %cst_13 : f32 to vector<8x128xf32>
    %24 = arith.mulf %14, %23 : vector<8x128xf32>
    %25 = arith.index_cast %c1_i32 : i32 to index
    %c0_14 = arith.constant 0 : index
    %c0_15 = arith.constant 0 : index
    %26 = vector.load %arg2[%25, %c0_14, %c0_15] : memref<8x8x128xf32, #tpu.memory_space<vmem>>, vector<1x8x128xf32>
    %27 = vector.shape_cast %26 : vector<1x8x128xf32> to vector<8x128xf32>
    %28 = arith.addf %24, %27 : vector<8x128xf32>
    %cst_16 = arith.constant dense<0.000000e+00> : vector<8x128xf32>
    %29 = tpu.matmul %22, %3, %cst_16 {dimension_numbers = #tpu.dot_dimension_numbers<[1], [0], [0], [1], [0, 0, 1, 1], [], []>} : vector<8x128xf32>, vector<128x128xf32>, vector<8x128xf32> -> vector<8x128xf32>
    %30 = arith.addf %28, %29 : vector<8x128xf32>
    %cst_17 = arith.constant 0.000000e+00 : f32
    %31 = vector.broadcast %cst_17 : f32 to vector<8x128xf32>
    %32 = arith.maximumf %30, %31 : vector<8x128xf32>
    %33 = arith.index_cast %c1_i32 : i32 to index
    %c0_18 = arith.constant 0 : index
    %c0_19 = arith.constant 0 : index
    %34 = vector.load %arg4[%33, %c0_18, %c0_19] : memref<8x8x128xf32, #tpu.memory_space<vmem>>, vector<1x8x128xf32>
    %35 = vector.shape_cast %34 : vector<1x8x128xf32> to vector<8x128xf32>
    %36 = vector.shape_cast %32 : vector<8x128xf32> to vector<1x8x128xf32>
    tpu.vector_store %arg4[%33, %c0_18, %c0_19], %36 {strides = array<i32>} : memref<8x8x128xf32, #tpu.memory_space<vmem>>, vector<1x8x128xf32>,
    %c2_i32 = arith.constant 2 : i32
    %cst_20 = arith.constant 0.000000e+00 : f32
    %37 = vector.broadcast %cst_20 : f32 to vector<8x128xf32>
    %38 = arith.maximumf %30, %37 : vector<8x128xf32>
    %cst_21 = arith.constant 8.000000e-01 : f32
    %39 = vector.broadcast %cst_21 : f32 to vector<8x128xf32>
    %40 = arith.mulf %30, %39 : vector<8x128xf32>
    %41 = arith.index_cast %c2_i32 : i32 to index
    %c0_22 = arith.constant 0 : index
    %c0_23 = arith.constant 0 : index
    %42 = vector.load %arg2[%41, %c0_22, %c0_23] : memref<8x8x128xf32, #tpu.memory_space<vmem>>, vector<1x8x128xf32>
    %43 = vector.shape_cast %42 : vector<1x8x128xf32> to vector<8x128xf32>
    %44 = arith.addf %40, %43 : vector<8x128xf32>
    %cst_24 = arith.constant dense<0.000000e+00> : vector<8x128xf32>
    %45 = tpu.matmul %38, %3, %cst_24 {dimension_numbers = #tpu.dot_dimension_numbers<[1], [0], [0], [1], [0, 0, 1, 1], [], []>} : vector<8x128xf32>, vector<128x128xf32>, vector<8x128xf32> -> vector<8x128xf32>
    %46 = arith.addf %44, %45 : vector<8x128xf32>
    %cst_25 = arith.constant 0.000000e+00 : f32
    %47 = vector.broadcast %cst_25 : f32 to vector<8x128xf32>
    %48 = arith.maximumf %46, %47 : vector<8x128xf32>
    %49 = arith.index_cast %c2_i32 : i32 to index
    %c0_26 = arith.constant 0 : index
    %c0_27 = arith.constant 0 : index
    %50 = vector.load %arg4[%49, %c0_26, %c0_27] : memref<8x8x128xf32, #tpu.memory_space<vmem>>, vector<1x8x128xf32>
    %51 = vector.shape_cast %50 : vector<1x8x128xf32> to vector<8x128xf32>
    %52 = vector.shape_cast %48 : vector<8x128xf32> to vector<1x8x128xf32>
    tpu.vector_store %arg4[%49, %c0_26, %c0_27], %52 {strides = array<i32>} : memref<8x8x128xf32, #tpu.memory_space<vmem>>, vector<1x8x128xf32>,
    %c3_i32 = arith.constant 3 : i32
    %cst_28 = arith.constant 0.000000e+00 : f32
    %53 = vector.broadcast %cst_28 : f32 to vector<8x128xf32>
    %54 = arith.maximumf %46, %53 : vector<8x128xf32>
    %cst_29 = arith.constant 8.000000e-01 : f32
    %55 = vector.broadcast %cst_29 : f32 to vector<8x128xf32>
    %56 = arith.mulf %46, %55 : vector<8x128xf32>
    %57 = arith.index_cast %c3_i32 : i32 to index
    %c0_30 = arith.constant 0 : index
    %c0_31 = arith.constant 0 : index
    %58 = vector.load %arg2[%57, %c0_30, %c0_31] : memref<8x8x128xf32, #tpu.memory_space<vmem>>, vector<1x8x128xf32>
    %59 = vector.shape_cast %58 : vector<1x8x128xf32> to vector<8x128xf32>
    %60 = arith.addf %56, %59 : vector<8x128xf32>
    %cst_32 = arith.constant dense<0.000000e+00> : vector<8x128xf32>
    %61 = tpu.matmul %54, %3, %cst_32 {dimension_numbers = #tpu.dot_dimension_numbers<[1], [0], [0], [1], [0, 0, 1, 1], [], []>} : vector<8x128xf32>, vector<128x128xf32>, vector<8x128xf32> -> vector<8x128xf32>
    %62 = arith.addf %60, %61 : vector<8x128xf32>
    %cst_33 = arith.constant 0.000000e+00 : f32
    %63 = vector.broadcast %cst_33 : f32 to vector<8x128xf32>
    %64 = arith.maximumf %62, %63 : vector<8x128xf32>
    %65 = arith.index_cast %c3_i32 : i32 to index
    %c0_34 = arith.constant 0 : index
    %c0_35 = arith.constant 0 : index
    %66 = vector.load %arg4[%65, %c0_34, %c0_35] : memref<8x8x128xf32, #tpu.memory_space<vmem>>, vector<1x8x128xf32>
    %67 = vector.shape_cast %66 : vector<1x8x128xf32> to vector<8x128xf32>
    %68 = vector.shape_cast %64 : vector<8x128xf32> to vector<1x8x128xf32>
    tpu.vector_store %arg4[%65, %c0_34, %c0_35], %68 {strides = array<i32>} : memref<8x8x128xf32, #tpu.memory_space<vmem>>, vector<1x8x128xf32>,
    %c4_i32 = arith.constant 4 : i32
    %cst_36 = arith.constant 0.000000e+00 : f32
    %69 = vector.broadcast %cst_36 : f32 to vector<8x128xf32>
    %70 = arith.maximumf %62, %69 : vector<8x128xf32>
    %cst_37 = arith.constant 8.000000e-01 : f32
    %71 = vector.broadcast %cst_37 : f32 to vector<8x128xf32>
    %72 = arith.mulf %62, %71 : vector<8x128xf32>
    %73 = arith.index_cast %c4_i32 : i32 to index
    %c0_38 = arith.constant 0 : index
    %c0_39 = arith.constant 0 : index
    %74 = vector.load %arg2[%73, %c0_38, %c0_39] : memref<8x8x128xf32, #tpu.memory_space<vmem>>, vector<1x8x128xf32>
    %75 = vector.shape_cast %74 : vector<1x8x128xf32> to vector<8x128xf32>
    %76 = arith.addf %72, %75 : vector<8x128xf32>
    %cst_40 = arith.constant dense<0.000000e+00> : vector<8x128xf32>
    %77 = tpu.matmul %70, %3, %cst_40 {dimension_numbers = #tpu.dot_dimension_numbers<[1], [0], [0], [1], [0, 0, 1, 1], [], []>} : vector<8x128xf32>, vector<128x128xf32>, vector<8x128xf32> -> vector<8x128xf32>
    %78 = arith.addf %76, %77 : vector<8x128xf32>
    %cst_41 = arith.constant 0.000000e+00 : f32
    %79 = vector.broadcast %cst_41 : f32 to vector<8x128xf32>
    %80 = arith.maximumf %78, %79 : vector<8x128xf32>
    %81 = arith.index_cast %c4_i32 : i32 to index
    %c0_42 = arith.constant 0 : index
    %c0_43 = arith.constant 0 : index
    %82 = vector.load %arg4[%81, %c0_42, %c0_43] : memref<8x8x128xf32, #tpu.memory_space<vmem>>, vector<1x8x128xf32>
    %83 = vector.shape_cast %82 : vector<1x8x128xf32> to vector<8x128xf32>
    %84 = vector.shape_cast %80 : vector<8x128xf32> to vector<1x8x128xf32>
    tpu.vector_store %arg4[%81, %c0_42, %c0_43], %84 {strides = array<i32>} : memref<8x8x128xf32, #tpu.memory_space<vmem>>, vector<1x8x128xf32>,
    %c5_i32 = arith.constant 5 : i32
    %cst_44 = arith.constant 0.000000e+00 : f32
    %85 = vector.broadcast %cst_44 : f32 to vector<8x128xf32>
    %86 = arith.maximumf %78, %85 : vector<8x128xf32>
    %cst_45 = arith.constant 8.000000e-01 : f32
    %87 = vector.broadcast %cst_45 : f32 to vector<8x128xf32>
    %88 = arith.mulf %78, %87 : vector<8x128xf32>
    %89 = arith.index_cast %c5_i32 : i32 to index
    %c0_46 = arith.constant 0 : index
    %c0_47 = arith.constant 0 : index
    %90 = vector.load %arg2[%89, %c0_46, %c0_47] : memref<8x8x128xf32, #tpu.memory_space<vmem>>, vector<1x8x128xf32>
    %91 = vector.shape_cast %90 : vector<1x8x128xf32> to vector<8x128xf32>
    %92 = arith.addf %88, %91 : vector<8x128xf32>
    %cst_48 = arith.constant dense<0.000000e+00> : vector<8x128xf32>
    %93 = tpu.matmul %86, %3, %cst_48 {dimension_numbers = #tpu.dot_dimension_numbers<[1], [0], [0], [1], [0, 0, 1, 1], [], []>} : vector<8x128xf32>, vector<128x128xf32>, vector<8x128xf32> -> vector<8x128xf32>
    %94 = arith.addf %92, %93 : vector<8x128xf32>
    %cst_49 = arith.constant 0.000000e+00 : f32
    %95 = vector.broadcast %cst_49 : f32 to vector<8x128xf32>
    %96 = arith.maximumf %94, %95 : vector<8x128xf32>
    %97 = arith.index_cast %c5_i32 : i32 to index
    %c0_50 = arith.constant 0 : index
    %c0_51 = arith.constant 0 : index
    %98 = vector.load %arg4[%97, %c0_50, %c0_51] : memref<8x8x128xf32, #tpu.memory_space<vmem>>, vector<1x8x128xf32>
    %99 = vector.shape_cast %98 : vector<1x8x128xf32> to vector<8x128xf32>
    %100 = vector.shape_cast %96 : vector<8x128xf32> to vector<1x8x128xf32>
    tpu.vector_store %arg4[%97, %c0_50, %c0_51], %100 {strides = array<i32>} : memref<8x8x128xf32, #tpu.memory_space<vmem>>, vector<1x8x128xf32>,
    %c6_i32 = arith.constant 6 : i32
    %cst_52 = arith.constant 0.000000e+00 : f32
    %101 = vector.broadcast %cst_52 : f32 to vector<8x128xf32>
    %102 = arith.maximumf %94, %101 : vector<8x128xf32>
    %cst_53 = arith.constant 8.000000e-01 : f32
    %103 = vector.broadcast %cst_53 : f32 to vector<8x128xf32>
    %104 = arith.mulf %94, %103 : vector<8x128xf32>
    %105 = arith.index_cast %c6_i32 : i32 to index
    %c0_54 = arith.constant 0 : index
    %c0_55 = arith.constant 0 : index
    %106 = vector.load %arg2[%105, %c0_54, %c0_55] : memref<8x8x128xf32, #tpu.memory_space<vmem>>, vector<1x8x128xf32>
    %107 = vector.shape_cast %106 : vector<1x8x128xf32> to vector<8x128xf32>
    %108 = arith.addf %104, %107 : vector<8x128xf32>
    %cst_56 = arith.constant dense<0.000000e+00> : vector<8x128xf32>
    %109 = tpu.matmul %102, %3, %cst_56 {dimension_numbers = #tpu.dot_dimension_numbers<[1], [0], [0], [1], [0, 0, 1, 1], [], []>} : vector<8x128xf32>, vector<128x128xf32>, vector<8x128xf32> -> vector<8x128xf32>
    %110 = arith.addf %108, %109 : vector<8x128xf32>
    %cst_57 = arith.constant 0.000000e+00 : f32
    %111 = vector.broadcast %cst_57 : f32 to vector<8x128xf32>
    %112 = arith.maximumf %110, %111 : vector<8x128xf32>
    %113 = arith.index_cast %c6_i32 : i32 to index
    %c0_58 = arith.constant 0 : index
    %c0_59 = arith.constant 0 : index
    %114 = vector.load %arg4[%113, %c0_58, %c0_59] : memref<8x8x128xf32, #tpu.memory_space<vmem>>, vector<1x8x128xf32>
    %115 = vector.shape_cast %114 : vector<1x8x128xf32> to vector<8x128xf32>
    %116 = vector.shape_cast %112 : vector<8x128xf32> to vector<1x8x128xf32>
    tpu.vector_store %arg4[%113, %c0_58, %c0_59], %116 {strides = array<i32>} : memref<8x8x128xf32, #tpu.memory_space<vmem>>, vector<1x8x128xf32>,
    %c7_i32 = arith.constant 7 : i32
    %cst_60 = arith.constant 0.000000e+00 : f32
    %117 = vector.broadcast %cst_60 : f32 to vector<8x128xf32>
    %118 = arith.maximumf %110, %117 : vector<8x128xf32>
    %cst_61 = arith.constant 8.000000e-01 : f32
    %119 = vector.broadcast %cst_61 : f32 to vector<8x128xf32>
    %120 = arith.mulf %110, %119 : vector<8x128xf32>
    %121 = arith.index_cast %c7_i32 : i32 to index
    %c0_62 = arith.constant 0 : index
    %c0_63 = arith.constant 0 : index
    %122 = vector.load %arg2[%121, %c0_62, %c0_63] : memref<8x8x128xf32, #tpu.memory_space<vmem>>, vector<1x8x128xf32>
    %123 = vector.shape_cast %122 : vector<1x8x128xf32> to vector<8x128xf32>
    %124 = arith.addf %120, %123 : vector<8x128xf32>
    %cst_64 = arith.constant dense<0.000000e+00> : vector<8x128xf32>
    %125 = tpu.matmul %118, %3, %cst_64 {dimension_numbers = #tpu.dot_dimension_numbers<[1], [0], [0], [1], [0, 0, 1, 1], [], []>} : vector<8x128xf32>, vector<128x128xf32>, vector<8x128xf32> -> vector<8x128xf32>
    %126 = arith.addf %124, %125 : vector<8x128xf32>
    %cst_65 = arith.constant 0.000000e+00 : f32
    %127 = vector.broadcast %cst_65 : f32 to vector<8x128xf32>
    %128 = arith.maximumf %126, %127 : vector<8x128xf32>
    %129 = arith.index_cast %c7_i32 : i32 to index
    %c0_66 = arith.constant 0 : index
    %c0_67 = arith.constant 0 : index
    %130 = vector.load %arg4[%129, %c0_66, %c0_67] : memref<8x8x128xf32, #tpu.memory_space<vmem>>, vector<1x8x128xf32>
    %131 = vector.shape_cast %130 : vector<1x8x128xf32> to vector<8x128xf32>
    %132 = vector.shape_cast %128 : vector<8x128xf32> to vector<1x8x128xf32>
    tpu.vector_store %arg4[%129, %c0_66, %c0_67], %132 {strides = array<i32>} : memref<8x8x128xf32, #tpu.memory_space<vmem>>, vector<1x8x128xf32>,
    %c8_i32 = arith.constant 8 : i32
    %c0_68 = arith.constant 0 : index
    %c0_69 = arith.constant 0 : index
    %133 = vector.load %arg5[%c0_68, %c0_69] : memref<8x128xf32, #tpu.memory_space<vmem>>, vector<8x128xf32>
    tpu.vector_store %arg5[%c0_68, %c0_69], %126 {strides = array<i32>} : memref<8x128xf32, #tpu.memory_space<vmem>>, vector<8x128xf32>,
    return
  }
  func.func @transform_0(%arg0: i32, %arg1: i32) -> (i32, i32, i32) {
    %c0_i32 = arith.constant 0 : i32
    %c0_i32_0 = arith.constant 0 : i32
    return %arg1, %arg0, %c0_i32 : i32, i32, i32
  }
  func.func @transform_1(%arg0: i32, %arg1: i32) -> (i32, i32) {
    %c0_i32 = arith.constant 0 : i32
    %c0_i32_0 = arith.constant 0 : i32
    %c0_i32_1 = arith.constant 0 : i32
    return %c0_i32, %c0_i32_0 : i32, i32
  }
  func.func @transform_2(%arg0: i32, %arg1: i32) -> (i32, i32, i32) {
    %c0_i32 = arith.constant 0 : i32
    %c0_i32_0 = arith.constant 0 : i32
    return %arg1, %arg0, %c0_i32 : i32, i32, i32
  }
}

</mosaic_0001>

<bundles_post_ra>
// kernel: ei_rnn_net_forward.1
= control target key start
LH: loop header
LB: loop body
LE: loop exit
PB: predicated region body
PF: predicated region fallthrough
CT: control target
= control target key end

     0   :  { %v1093_v0 = vmov 0.0   ;;  %vm1094_vm0 = vmmov 0   ;;  %s1511_s1 = inlined_call_operand.vmem [shape: f32[128,128], index: 1, kind: input, shape index: {}]   ;;  %s1512_s0 = inlined_call_operand.vmem [shape: f32[8,8,128], index: 0, kind: input, shape index: {}]   ;;  %s1513_s2 = inlined_call_operand.vmem [shape: f32[8,8,128], index: 2, kind: output, shape index: {}]  }
   0x1   :  { %811 = vmatprep.subr.mxu0 %v1093_v0  ;;  %v1114_v1 = vld [vmem:[%s1511_s1 + $0x78] sm:$0xff]  ;;  %v1119_v2 = vld [vmem:[%s1511_s1 + $0x70] sm:$0xff]  ;;  %843 = vmatprep.mubr.msk.f32.mxu0 %vm1094_vm0, %v1093_v0  ;;  %v1129_v3 = vld [vmem:[%s1511_s1 + $0x68] sm:$0xff] }
   0x2   :  { %812 = vmatpush3.msra.mxu0 %v1114_v1  ;;  %846 = vmatprep.subr.mxu1 %v1093_v0  ;;  %v1138_v4 = vld [vmem:[%s1511_s1 + $0x60] sm:$0xff]  ;;  %v1147_v5 = vld [vmem:[%s1511_s1 + $0x58] sm:$0xff]  ;;  %v1156_v6 = vld [vmem:[%s1511_s1 + $0x50] sm:$0xff] }
   0x3   :  { %813 = vmatprep.subr.mxu0 %v1093_v0  ;;  %847 = vmatpush3.msra.mxu1 %v1114_v1  ;;  %v1165_v7 = vld [vmem:[%s1511_s1 + $0x48] sm:$0xff]  ;;  %v1174_v8 = vld [vmem:[%s1511_s1 + $0x40] sm:$0xff]  ;;  %v1183_v9 = vld [vmem:[%s1511_s1 + $0x38] sm:$0xff] }
   0x4   :  { %814 = vmatpush3.msra.mxu0 %v1119_v2  ;;  %848 = vmatprep.subr.mxu1 %v1093_v0  ;;  %v1192_v10 = vld [vmem:[%s1511_s1 + $0x30] sm:$0xff]  ;;  %v1201_v11 = vld [vmem:[%s1511_s1 + $0x28] sm:$0xff]  ;;  %v1210_v12 = vld [vmem:[%s1511_s1 + $0x20] sm:$0xff] }
   0x5   :  { %815 = vmatprep.subr.mxu0 %v1093_v0  ;;  %849 = vmatpush3.msra.mxu1 %v1119_v2  ;;  %v1219_v13 = vld [vmem:[%s1511_s1 + $0x18] sm:$0xff]  ;;  %v1228_v14 = vld [vmem:[%s1511_s1 + $0x10] sm:$0xff]  ;;  %v1237_v15 = vld [vmem:[%s1511_s1 + $0x8] sm:$0xff] }
   0x6   :  { %816 = vmatpush3.msra.mxu0 %v1129_v3  ;;  %850 = vmatprep.subr.mxu1 %v1093_v0  ;;  %v1246_v16 = vld [vmem:[%s1511_s1] sm:$0xff]  ;;  %v661_v23 = vld [vmem:[%s1512_s0 + $0x8] sm:$0xff]  ;;  %v663_v30 = vld [vmem:[%s1512_s0 + $0x10] sm:$0xff] }
   0x7   :  { %817 = vmatprep.subr.mxu0 %v1093_v0  ;;  %851 = vmatpush3.msra.mxu1 %v1129_v3  ;;  %v35_v17 = vld [vmem:[%s1512_s0] sm:$0xff]  ;;  %v665_v37 = vld [vmem:[%s1512_s0 + $0x18] sm:$0xff]  ;;  %v669_v51 = vld [vmem:[%s1512_s0 + $0x28] sm:$0xff] }
   0x8   :  { %818 = vmatpush3.msra.mxu0 %v1138_v4  ;;  %852 = vmatprep.subr.mxu1 %v1093_v0  ;;  %v667_v44 = vld [vmem:[%s1512_s0 + $0x20] sm:$0xff]  ;;  %v671_v58 = vld [vmem:[%s1512_s0 + $0x30] sm:$0xff] }
   0x9   :  { %819 = vmatprep.subr.mxu0 %v1093_v0  ;;  %853 = vmatpush3.msra.mxu1 %v1138_v4 }
   0xa   :  { %820 = vmatpush3.msra.mxu0 %v1147_v5  ;;  %854 = vmatprep.subr.mxu1 %v1093_v0 }
   0xb   :  { %821 = vmatprep.subr.mxu0 %v1093_v0  ;;  %855 = vmatpush3.msra.mxu1 %v1147_v5 }
   0xc   :  { %822 = vmatpush3.msra.mxu0 %v1156_v6  ;;  %856 = vmatprep.subr.mxu1 %v1093_v0 }
   0xd   :  { %823 = vmatprep.subr.mxu0 %v1093_v0  ;;  %857 = vmatpush3.msra.mxu1 %v1156_v6 }
   0xe   :  { %824 = vmatpush3.msra.mxu0 %v1165_v7  ;;  %858 = vmatprep.subr.mxu1 %v1093_v0 }
   0xf   :  { %825 = vmatprep.subr.mxu0 %v1093_v0  ;;  %859 = vmatpush3.msra.mxu1 %v1165_v7 }
  0x10   :  { %826 = vmatpush3.msra.mxu0 %v1174_v8  ;;  %860 = vmatprep.subr.mxu1 %v1093_v0 }
  0x11   :  { %827 = vmatprep.subr.mxu0 %v1093_v0  ;;  %861 = vmatpush3.msra.mxu1 %v1174_v8 }
  0x12   :  { %828 = vmatpush3.msra.mxu0 %v1183_v9  ;;  %862 = vmatprep.subr.mxu1 %v1093_v0 }
  0x13   :  { %829 = vmatprep.subr.mxu0 %v1093_v0  ;;  %863 = vmatpush3.msra.mxu1 %v1183_v9 }
  0x14   :  { %830 = vmatpush3.msra.mxu0 %v1192_v10  ;;  %864 = vmatprep.subr.mxu1 %v1093_v0 }
  0x15   :  { %831 = vmatprep.subr.mxu0 %v1093_v0  ;;  %865 = vmatpush3.msra.mxu1 %v1192_v10 }
  0x16   :  { %832 = vmatpush3.msra.mxu0 %v1201_v11  ;;  %866 = vmatprep.subr.mxu1 %v1093_v0 }
  0x17   :  { %833 = vmatprep.subr.mxu0 %v1093_v0  ;;  %867 = vmatpush3.msra.mxu1 %v1201_v11 }
  0x18   :  { %834 = vmatpush3.msra.mxu0 %v1210_v12  ;;  %868 = vmatprep.subr.mxu1 %v1093_v0 }
  0x19   :  { %835 = vmatprep.subr.mxu0 %v1093_v0  ;;  %869 = vmatpush3.msra.mxu1 %v1210_v12 }
  0x1a   :  { %836 = vmatpush3.msra.mxu0 %v1219_v13  ;;  %870 = vmatprep.subr.mxu1 %v1093_v0 }
  0x1b   :  { %837 = vmatprep.subr.mxu0 %v1093_v0  ;;  %871 = vmatpush3.msra.mxu1 %v1219_v13 }
  0x1c   :  { %838 = vmatpush3.msra.mxu0 %v1228_v14  ;;  %872 = vmatprep.subr.mxu1 %v1093_v0 }
  0x1d   :  { %839 = vmatprep.subr.mxu0 %v1093_v0  ;;  %873 = vmatpush3.msra.mxu1 %v1228_v14 }
  0x1e   :  { %840 = vmatpush3.msra.mxu0 %v1237_v15  ;;  %874 = vmatprep.subr.mxu1 %v1093_v0 }
  0x1f   :  { %841 = vmatprep.subr.mxu0 %v1093_v0  ;;  %875 = vmatpush3.msra.mxu1 %v1237_v15 }
  0x20   :  { %842 = vmatpush3.msra.mxu0 %v1246_v16  ;;  %876 = vmatprep.subr.mxu1 %v1093_v0 }
  0x21   :  { %844 = vmatmul.mubr.f32.vlgmr.msra.gmra.mxu0 %v1093_v0  ;;  %877 = vmatpush3.msra.mxu1 %v1246_v16 }
  0x22   :  { %878 = vmatprep.mubr.msk.f32.mxu1 %vm1094_vm0, %v1093_v0  ;;  %881 = vmatprep.subr.mxu0 %v1093_v0 }
  0x23   :  { %882 = vmatpush3.msra.mxu0 %v1114_v1  ;;  %913 = vmatprep.mubr.msk.f32.mxu0 %vm1094_vm0, %v1093_v0 }
  0x24   :  { %883 = vmatprep.subr.mxu0 %v1093_v0  ;;  %916 = vmatprep.subr.mxu1 %v1093_v0 }
  0x25   :  { %884 = vmatpush3.msra.mxu0 %v1119_v2 }
  0x26   :  { %885 = vmatprep.subr.mxu0 %v1093_v0 }
  0x27   :  { %886 = vmatpush3.msra.mxu0 %v1129_v3 }
  0x28   :  { %887 = vmatprep.subr.mxu0 %v1093_v0 }
  0x29   :  { %888 = vmatpush3.msra.mxu0 %v1138_v4 }
  0x2a   :  { %889 = vmatprep.subr.mxu0 %v1093_v0 }
  0x2b   :  { %890 = vmatpush3.msra.mxu0 %v1147_v5 }
  0x2c   :  { %891 = vmatprep.subr.mxu0 %v1093_v0 }
  0x2d   :  { %892 = vmatpush3.msra.mxu0 %v1156_v6 }
  0x2e   :  { %893 = vmatprep.subr.mxu0 %v1093_v0 }
  0x2f   :  { %894 = vmatpush3.msra.mxu0 %v1165_v7 }
  0x30   :  { %895 = vmatprep.subr.mxu0 %v1093_v0 }
  0x31   :  { %896 = vmatpush3.msra.mxu0 %v1174_v8 }
  0x32   :  { %897 = vmatprep.subr.mxu0 %v1093_v0 }
  0x33   :  { %898 = vmatpush3.msra.mxu0 %v1183_v9 }
  0x34   :  { %899 = vmatprep.subr.mxu0 %v1093_v0 }
  0x35   :  { %900 = vmatpush3.msra.mxu0 %v1192_v10 }
  0x36   :  { %901 = vmatprep.subr.mxu0 %v1093_v0 }
  0x37   :  { %902 = vmatpush3.msra.mxu0 %v1201_v11 }
  0x38   :  { %903 = vmatprep.subr.mxu0 %v1093_v0 }
  0x39   :  { %904 = vmatpush3.msra.mxu0 %v1210_v12 }
  0x3a   :  { %905 = vmatprep.subr.mxu0 %v1093_v0 }
  0x3b   :  { %906 = vmatpush3.msra.mxu0 %v1219_v13 }
  0x3c   :  { %907 = vmatprep.subr.mxu0 %v1093_v0 }
  0x3d   :  { %908 = vmatpush3.msra.mxu0 %v1228_v14 }
  0x3e   :  { %909 = vmatprep.subr.mxu0 %v1093_v0 }
  0x3f   :  { %910 = vmatpush3.msra.mxu0 %v1237_v15 }
  0x40   :  { %911 = vmatprep.subr.mxu0 %v1093_v0 }
  0x41   :  { %912 = vmatpush3.msra.mxu0 %v1246_v16 }
  0x42   :  { %951 = vmatprep.subr.mxu0 %v1093_v0 }
  0xe1   :  { %v103_v18 = vpop.f32.mrf.mxu0 }
  0xe2   :  { %v107_v19 = vadd.f32 %v103_v18, %v35_v17 }
  0xe3   :  { %v845_v20 = vpop.f32.mrf.mxu0 }
  0xe4   :  { %v108_v21 = vmax.f32 %v107_v19, 0.0  ;;  %v110_v22 = vmul.f32 0.8, %v107_v19 }
  0xe6   :  { %109 = vst [vmem:[%s1513_s2] sm:$0xff] %v108_v21  ;;  %879 = vmatmul.mubr.f32.vlgmr.msra.gmra.mxu1 %v108_v21  ;;  %v113_v24 = vadd.f32 %v661_v23, %v110_v22 }
  0xe7   :  { %917 = vmatpush3.msra.mxu1 %v1114_v1  ;;  %948 = vmatprep.mubr.msk.f32.mxu1 %vm1094_vm0, %v1093_v0 }
  0xe8   :  { %918 = vmatprep.subr.mxu1 %v1093_v0 }
  0xe9   :  { %919 = vmatpush3.msra.mxu1 %v1119_v2 }
  0xea   :  { %920 = vmatprep.subr.mxu1 %v1093_v0 }
  0xeb   :  { %921 = vmatpush3.msra.mxu1 %v1129_v3 }
  0xec   :  { %922 = vmatprep.subr.mxu1 %v1093_v0 }
  0xed   :  { %923 = vmatpush3.msra.mxu1 %v1138_v4 }
  0xee   :  { %924 = vmatprep.subr.mxu1 %v1093_v0 }
  0xef   :  { %925 = vmatpush3.msra.mxu1 %v1147_v5 }
  0xf0   :  { %926 = vmatprep.subr.mxu1 %v1093_v0 }
  0xf1   :  { %927 = vmatpush3.msra.mxu1 %v1156_v6 }
  0xf2   :  { %928 = vmatprep.subr.mxu1 %v1093_v0 }
  0xf3   :  { %929 = vmatpush3.msra.mxu1 %v1165_v7 }
  0xf4   :  { %930 = vmatprep.subr.mxu1 %v1093_v0 }
  0xf5   :  { %931 = vmatpush3.msra.mxu1 %v1174_v8 }
  0xf6   :  { %932 = vmatprep.subr.mxu1 %v1093_v0 }
  0xf7   :  { %933 = vmatpush3.msra.mxu1 %v1183_v9 }
  0xf8   :  { %934 = vmatprep.subr.mxu1 %v1093_v0 }
  0xf9   :  { %935 = vmatpush3.msra.mxu1 %v1192_v10 }
  0xfa   :  { %936 = vmatprep.subr.mxu1 %v1093_v0 }
  0xfb   :  { %937 = vmatpush3.msra.mxu1 %v1201_v11 }
  0xfc   :  { %938 = vmatprep.subr.mxu1 %v1093_v0 }
  0xfd   :  { %939 = vmatpush3.msra.mxu1 %v1210_v12 }
  0xfe   :  { %940 = vmatprep.subr.mxu1 %v1093_v0 }
  0xff   :  { %941 = vmatpush3.msra.mxu1 %v1219_v13 }
 0x100   :  { %942 = vmatprep.subr.mxu1 %v1093_v0 }
 0x101   :  { %943 = vmatpush3.msra.mxu1 %v1228_v14 }
 0x102   :  { %944 = vmatprep.subr.mxu1 %v1093_v0 }
 0x103   :  { %945 = vmatpush3.msra.mxu1 %v1237_v15 }
 0x104   :  { %946 = vmatprep.subr.mxu1 %v1093_v0 }
 0x105   :  { %947 = vmatpush3.msra.mxu1 %v1246_v16 }
 0x106   :  { %986 = vmatprep.subr.mxu1 %v1093_v0 }
 0x1a6   :  { %v180_v25 = vpop.f32.mrf.mxu1 }
 0x1a7   :  { %v184_v26 = vadd.f32 %v180_v25, %v113_v24 }
 0x1a8   :  { %v880_v27 = vpop.f32.mrf.mxu1 }
 0x1a9   :  { %v185_v28 = vmax.f32 %v184_v26, 0.0  ;;  %v188_v29 = vmul.f32 0.8, %v184_v26 }
 0x1ab   :  { %662 = vst [vmem:[%s1513_s2 + $0x8] sm:$0xff] %v185_v28  ;;  %914 = vmatmul.mubr.f32.vlgmr.msra.gmra.mxu0 %v185_v28  ;;  %v191_v31 = vadd.f32 %v663_v30, %v188_v29 }
 0x1ac   :  { %952 = vmatpush3.msra.mxu0 %v1114_v1  ;;  %983 = vmatprep.mubr.msk.f32.mxu0 %vm1094_vm0, %v1093_v0 }
 0x1ad   :  { %953 = vmatprep.subr.mxu0 %v1093_v0 }
 0x1ae   :  { %954 = vmatpush3.msra.mxu0 %v1119_v2 }
 0x1af   :  { %955 = vmatprep.subr.mxu0 %v1093_v0 }
 0x1b0   :  { %956 = vmatpush3.msra.mxu0 %v1129_v3 }
 0x1b1   :  { %957 = vmatprep.subr.mxu0 %v1093_v0 }
 0x1b2   :  { %958 = vmatpush3.msra.mxu0 %v1138_v4 }
 0x1b3   :  { %959 = vmatprep.subr.mxu0 %v1093_v0 }
 0x1b4   :  { %960 = vmatpush3.msra.mxu0 %v1147_v5 }
 0x1b5   :  { %961 = vmatprep.subr.mxu0 %v1093_v0 }
 0x1b6   :  { %962 = vmatpush3.msra.mxu0 %v1156_v6 }
 0x1b7   :  { %963 = vmatprep.subr.mxu0 %v1093_v0 }
 0x1b8   :  { %964 = vmatpush3.msra.mxu0 %v1165_v7 }
 0x1b9   :  { %965 = vmatprep.subr.mxu0 %v1093_v0 }
 0x1ba   :  { %966 = vmatpush3.msra.mxu0 %v1174_v8 }
 0x1bb   :  { %967 = vmatprep.subr.mxu0 %v1093_v0 }
 0x1bc   :  { %968 = vmatpush3.msra.mxu0 %v1183_v9 }
 0x1bd   :  { %969 = vmatprep.subr.mxu0 %v1093_v0 }
 0x1be   :  { %970 = vmatpush3.msra.mxu0 %v1192_v10 }
 0x1bf   :  { %971 = vmatprep.subr.mxu0 %v1093_v0 }
 0x1c0   :  { %972 = vmatpush3.msra.mxu0 %v1201_v11 }
 0x1c1   :  { %973 = vmatprep.subr.mxu0 %v1093_v0 }
 0x1c2   :  { %974 = vmatpush3.msra.mxu0 %v1210_v12 }
 0x1c3   :  { %975 = vmatprep.subr.mxu0 %v1093_v0 }
 0x1c4   :  { %976 = vmatpush3.msra.mxu0 %v1219_v13 }
 0x1c5   :  { %977 = vmatprep.subr.mxu0 %v1093_v0 }
 0x1c6   :  { %978 = vmatpush3.msra.mxu0 %v1228_v14 }
 0x1c7   :  { %979 = vmatprep.subr.mxu0 %v1093_v0 }
 0x1c8   :  { %980 = vmatpush3.msra.mxu0 %v1237_v15 }
 0x1c9   :  { %981 = vmatprep.subr.mxu0 %v1093_v0 }
 0x1ca   :  { %982 = vmatpush3.msra.mxu0 %v1246_v16 }
 0x1cb   :  { %1021 = vmatprep.subr.mxu0 %v1093_v0 }
 0x26b   :  { %v258_v32 = vpop.f32.mrf.mxu0 }
 0x26c   :  { %v262_v33 = vadd.f32 %v258_v32, %v191_v31 }
 0x26d   :  { %v915_v34 = vpop.f32.mrf.mxu0 }
 0x26e   :  { %v263_v35 = vmax.f32 %v262_v33, 0.0  ;;  %v266_v36 = vmul.f32 0.8, %v262_v33 }
 0x270   :  { %664 = vst [vmem:[%s1513_s2 + $0x10] sm:$0xff] %v263_v35  ;;  %949 = vmatmul.mubr.f32.vlgmr.msra.gmra.mxu1 %v263_v35  ;;  %v269_v38 = vadd.f32 %v665_v37, %v266_v36 }
 0x271   :  { %987 = vmatpush3.msra.mxu1 %v1114_v1  ;;  %1018 = vmatprep.mubr.msk.f32.mxu1 %vm1094_vm0, %v1093_v0 }
 0x272   :  { %988 = vmatprep.subr.mxu1 %v1093_v0 }
 0x273   :  { %989 = vmatpush3.msra.mxu1 %v1119_v2 }
 0x274   :  { %990 = vmatprep.subr.mxu1 %v1093_v0 }
 0x275   :  { %991 = vmatpush3.msra.mxu1 %v1129_v3 }
 0x276   :  { %992 = vmatprep.subr.mxu1 %v1093_v0 }
 0x277   :  { %993 = vmatpush3.msra.mxu1 %v1138_v4 }
 0x278   :  { %994 = vmatprep.subr.mxu1 %v1093_v0 }
 0x279   :  { %995 = vmatpush3.msra.mxu1 %v1147_v5 }
 0x27a   :  { %996 = vmatprep.subr.mxu1 %v1093_v0 }
 0x27b   :  { %997 = vmatpush3.msra.mxu1 %v1156_v6 }
 0x27c   :  { %998 = vmatprep.subr.mxu1 %v1093_v0 }
 0x27d   :  { %999 = vmatpush3.msra.mxu1 %v1165_v7 }
 0x27e   :  { %1000 = vmatprep.subr.mxu1 %v1093_v0 }
 0x27f   :  { %1001 = vmatpush3.msra.mxu1 %v1174_v8 }
 0x280   :  { %1002 = vmatprep.subr.mxu1 %v1093_v0 }
 0x281   :  { %1003 = vmatpush3.msra.mxu1 %v1183_v9 }
 0x282   :  { %1004 = vmatprep.subr.mxu1 %v1093_v0 }
 0x283   :  { %1005 = vmatpush3.msra.mxu1 %v1192_v10 }
 0x284   :  { %1006 = vmatprep.subr.mxu1 %v1093_v0 }
 0x285   :  { %1007 = vmatpush3.msra.mxu1 %v1201_v11 }
 0x286   :  { %1008 = vmatprep.subr.mxu1 %v1093_v0 }
 0x287   :  { %1009 = vmatpush3.msra.mxu1 %v1210_v12 }
 0x288   :  { %1010 = vmatprep.subr.mxu1 %v1093_v0 }
 0x289   :  { %1011 = vmatpush3.msra.mxu1 %v1219_v13 }
 0x28a   :  { %1012 = vmatprep.subr.mxu1 %v1093_v0 }
 0x28b   :  { %1013 = vmatpush3.msra.mxu1 %v1228_v14 }
 0x28c   :  { %1014 = vmatprep.subr.mxu1 %v1093_v0 }
 0x28d   :  { %1015 = vmatpush3.msra.mxu1 %v1237_v15 }
 0x28e   :  { %1016 = vmatprep.subr.mxu1 %v1093_v0 }
 0x28f   :  { %1017 = vmatpush3.msra.mxu1 %v1246_v16 }
 0x290   :  { %1056 = vmatprep.subr.mxu1 %v1093_v0 }
 0x330   :  { %v336_v39 = vpop.f32.mrf.mxu1 }
 0x331   :  { %v340_v40 = vadd.f32 %v336_v39, %v269_v38 }
 0x332   :  { %v950_v41 = vpop.f32.mrf.mxu1 }
 0x333   :  { %v341_v42 = vmax.f32 %v340_v40, 0.0  ;;  %v344_v43 = vmul.f32 0.8, %v340_v40 }
 0x335   :  { %666 = vst [vmem:[%s1513_s2 + $0x18] sm:$0xff] %v341_v42  ;;  %984 = vmatmul.mubr.f32.vlgmr.msra.gmra.mxu0 %v341_v42  ;;  %v347_v45 = vadd.f32 %v667_v44, %v344_v43 }
 0x336   :  { %1022 = vmatpush3.msra.mxu0 %v1114_v1  ;;  %1053 = vmatprep.mubr.msk.f32.mxu0 %vm1094_vm0, %v1093_v0 }
 0x337   :  { %1023 = vmatprep.subr.mxu0 %v1093_v0 }
 0x338   :  { %1024 = vmatpush3.msra.mxu0 %v1119_v2 }
 0x339   :  { %1025 = vmatprep.subr.mxu0 %v1093_v0 }
 0x33a   :  { %1026 = vmatpush3.msra.mxu0 %v1129_v3 }
 0x33b   :  { %1027 = vmatprep.subr.mxu0 %v1093_v0 }
 0x33c   :  { %1028 = vmatpush3.msra.mxu0 %v1138_v4 }
 0x33d   :  { %1029 = vmatprep.subr.mxu0 %v1093_v0 }
 0x33e   :  { %1030 = vmatpush3.msra.mxu0 %v1147_v5 }
 0x33f   :  { %1031 = vmatprep.subr.mxu0 %v1093_v0 }
 0x340   :  { %1032 = vmatpush3.msra.mxu0 %v1156_v6 }
 0x341   :  { %1033 = vmatprep.subr.mxu0 %v1093_v0 }
 0x342   :  { %1034 = vmatpush3.msra.mxu0 %v1165_v7 }
 0x343   :  { %1035 = vmatprep.subr.mxu0 %v1093_v0 }
 0x344   :  { %1036 = vmatpush3.msra.mxu0 %v1174_v8 }
 0x345   :  { %1037 = vmatprep.subr.mxu0 %v1093_v0 }
 0x346   :  { %1038 = vmatpush3.msra.mxu0 %v1183_v9 }
 0x347   :  { %1039 = vmatprep.subr.mxu0 %v1093_v0 }
 0x348   :  { %1040 = vmatpush3.msra.mxu0 %v1192_v10 }
 0x349   :  { %1041 = vmatprep.subr.mxu0 %v1093_v0 }
 0x34a   :  { %1042 = vmatpush3.msra.mxu0 %v1201_v11 }
 0x34b   :  { %1043 = vmatprep.subr.mxu0 %v1093_v0 }
 0x34c   :  { %1044 = vmatpush3.msra.mxu0 %v1210_v12 }
 0x34d   :  { %1045 = vmatprep.subr.mxu0 %v1093_v0 }
 0x34e   :  { %1046 = vmatpush3.msra.mxu0 %v1219_v13 }
 0x34f   :  { %1047 = vmatprep.subr.mxu0 %v1093_v0 }
 0x350   :  { %1048 = vmatpush3.msra.mxu0 %v1228_v14 }
 0x351   :  { %1049 = vmatprep.subr.mxu0 %v1093_v0 }
 0x352   :  { %1050 = vmatpush3.msra.mxu0 %v1237_v15 }
 0x353   :  { %1051 = vmatprep.subr.mxu0 %v1093_v0 }
 0x354   :  { %1052 = vmatpush3.msra.mxu0 %v1246_v16 }
 0x3f5   :  { %v414_v46 = vpop.f32.mrf.mxu0 }
 0x3f6   :  { %v418_v47 = vadd.f32 %v414_v46, %v347_v45 }
 0x3f7   :  { %v985_v48 = vpop.f32.mrf.mxu0 }
 0x3f8   :  { %v419_v49 = vmax.f32 %v418_v47, 0.0  ;;  %v422_v50 = vmul.f32 0.8, %v418_v47 }
 0x3fa   :  { %668 = vst [vmem:[%s1513_s2 + $0x20] sm:$0xff] %v419_v49  ;;  %1019 = vmatmul.mubr.f32.vlgmr.msra.gmra.mxu1 %v419_v49  ;;  %v425_v52 = vadd.f32 %v669_v51, %v422_v50 }
 0x3fb   :  { %1057 = vmatpush3.msra.mxu1 %v1114_v1  ;;  %1088 = vmatprep.mubr.msk.f32.mxu1 %vm1094_vm0, %v1093_v0  ;;  %v673_v1 = vld [vmem:[%s1512_s0 + $0x38] sm:$0xff] }
 0x3fc   :  { %1058 = vmatprep.subr.mxu1 %v1093_v0 }
 0x3fd   :  { %1059 = vmatpush3.msra.mxu1 %v1119_v2 }
 0x3fe   :  { %1060 = vmatprep.subr.mxu1 %v1093_v0 }
 0x3ff   :  { %1061 = vmatpush3.msra.mxu1 %v1129_v3 }
 0x400   :  { %1062 = vmatprep.subr.mxu1 %v1093_v0 }
 0x401   :  { %1063 = vmatpush3.msra.mxu1 %v1138_v4 }
 0x402   :  { %1064 = vmatprep.subr.mxu1 %v1093_v0 }
 0x403   :  { %1065 = vmatpush3.msra.mxu1 %v1147_v5 }
 0x404   :  { %1066 = vmatprep.subr.mxu1 %v1093_v0 }
 0x405   :  { %1067 = vmatpush3.msra.mxu1 %v1156_v6 }
 0x406   :  { %1068 = vmatprep.subr.mxu1 %v1093_v0 }
 0x407   :  { %1069 = vmatpush3.msra.mxu1 %v1165_v7 }
 0x408   :  { %1070 = vmatprep.subr.mxu1 %v1093_v0 }
 0x409   :  { %1071 = vmatpush3.msra.mxu1 %v1174_v8 }
 0x40a   :  { %1072 = vmatprep.subr.mxu1 %v1093_v0 }
 0x40b   :  { %1073 = vmatpush3.msra.mxu1 %v1183_v9 }
 0x40c   :  { %1074 = vmatprep.subr.mxu1 %v1093_v0 }
 0x40d   :  { %1075 = vmatpush3.msra.mxu1 %v1192_v10 }
 0x40e   :  { %1076 = vmatprep.subr.mxu1 %v1093_v0 }
 0x40f   :  { %1077 = vmatpush3.msra.mxu1 %v1201_v11 }
 0x410   :  { %1078 = vmatprep.subr.mxu1 %v1093_v0 }
 0x411   :  { %1079 = vmatpush3.msra.mxu1 %v1210_v12 }
 0x412   :  { %1080 = vmatprep.subr.mxu1 %v1093_v0 }
 0x413   :  { %1081 = vmatpush3.msra.mxu1 %v1219_v13 }
 0x414   :  { %1082 = vmatprep.subr.mxu1 %v1093_v0 }
 0x415   :  { %1083 = vmatpush3.msra.mxu1 %v1228_v14 }
 0x416   :  { %1084 = vmatprep.subr.mxu1 %v1093_v0 }
 0x417   :  { %1085 = vmatpush3.msra.mxu1 %v1237_v15 }
 0x418   :  { %1086 = vmatprep.subr.mxu1 %v1093_v0 }
 0x419   :  { %1087 = vmatpush3.msra.mxu1 %v1246_v16 }
 0x4ba   :  { %v492_v53 = vpop.f32.mrf.mxu1 }
 0x4bb   :  { %v496_v54 = vadd.f32 %v492_v53, %v425_v52 }
 0x4bc   :  { %v1020_v55 = vpop.f32.mrf.mxu1 }
 0x4bd   :  { %v497_v56 = vmax.f32 %v496_v54, 0.0  ;;  %v500_v57 = vmul.f32 0.8, %v496_v54 }
 0x4bf   :  { %670 = vst [vmem:[%s1513_s2 + $0x28] sm:$0xff] %v497_v56  ;;  %1054 = vmatmul.mubr.f32.vlgmr.msra.gmra.mxu0 %v497_v56  ;;  %v503_v59 = vadd.f32 %v671_v58, %v500_v57 }
 0x57f   :  { %v570_v60 = vpop.f32.mrf.mxu0 }
 0x580   :  { %v574_v61 = vadd.f32 %v570_v60, %v503_v59 }
 0x581   :  { %v1055_v62 = vpop.f32.mrf.mxu0 }
 0x582   :  { %v575_v63 = vmax.f32 %v574_v61, 0.0  ;;  %v578_v0 = vmul.f32 0.8, %v574_v61 }
 0x584   :  { %672 = vst [vmem:[%s1513_s2 + $0x30] sm:$0xff] %v575_v63  ;;  %1089 = vmatmul.mubr.f32.vlgmr.msra.gmra.mxu1 %v575_v63  ;;  %v581_v2 = vadd.f32 %v673_v1, %v578_v0 }
 0x644   :  { %v648_v3 = vpop.f32.mrf.mxu1 }
 0x645   :  { %v652_v4 = vadd.f32 %v648_v3, %v581_v2 }
 0x646   :  { %v1090_v5 = vpop.f32.mrf.mxu1 }
 0x647   :  { %v653_v6 = vmax.f32 %v652_v4, 0.0 }
 0x649   :  { %674 = vst [vmem:[%s1513_s2 + $0x38] sm:$0xff] %v653_v6 }

</bundles_post_ra>
